<compile_context>
chip_gen: v7x
topology: tpu7x:2x2x1
jax: 0.10.0
libtpu: 0.0.40
codegen_flags: <defaults>
</compile_context>

<pallas_src>
import functools

import jax
import jax.numpy as jnp
from jax.experimental import pallas as pl
from jax.experimental.pallas import tpu as pltpu

NEG_SLOPE = 0.01  # F.leaky_relu default


def _leaky_relu(v):
    return jnp.where(v > 0, v, NEG_SLOPE * v)


def _round_up(x, m):
    return (x + m - 1) // m * m


def _make_kernel(n_inputs, d_out, out_cols):
    """Build the fused kernel for a static number of input tensors."""

    def kernel(*refs):
        xs = refs[:n_inputs]                       # bf16 activations, (tile, f_i)
        w1s = refs[n_inputs:2 * n_inputs]          # bf16 W1 row-blocks, (f_i, hidden)
        (b1_ref, w2_ref, b2_ref,
         wh_ref, bh_ref, noise_ref) = refs[2 * n_inputs:2 * n_inputs + 6]
        out_ref = refs[2 * n_inputs + 6]

        # mlp1: h1 = leaky_relu(sum_i x_i @ W1_i + b1)   (in-kernel "concat")
        acc = jnp.dot(xs[0][...], w1s[0][...], preferred_element_type=jnp.float32)
        for i in range(1, n_inputs):
            acc = acc + jnp.dot(
                xs[i][...], w1s[i][...], preferred_element_type=jnp.float32
            )
        h1 = _leaky_relu(acc + b1_ref[...])

        # mlp2
        h2 = _leaky_relu(
            jnp.dot(h1.astype(w2_ref.dtype), w2_ref[...],
                    preferred_element_type=jnp.float32)
            + b2_ref[...]
        )

        # mlp3 is folded into the fused head weight (D, 2D): [mu | logvar]
        heads = (
            jnp.dot(h2.astype(wh_ref.dtype), wh_ref[...],
                    preferred_element_type=jnp.float32)
            + bh_ref[...]
        )
        mu = heads[:, :d_out]
        logvar = heads[:, d_out:]

        # reparameterization (f32 on every chip generation)
        z = mu + jnp.exp(logvar * 0.5) * noise_ref[...]

        # single lane-dense output: [z | mu | logvar | zero-pad to out_cols]
        pieces = [z, mu, logvar]
        pad = out_cols - 3 * d_out
        if pad:
            pieces.append(jnp.zeros((z.shape[0], pad), jnp.float32))
        out_ref[...] = jnp.concatenate(pieces, axis=-1).astype(out_ref.dtype)

    return kernel


@functools.partial(jax.jit, static_argnames=("batch_tile",))
def actor_encoder_forward(inputs, params, noise, batch_tile=256):
    """inputs: list of (B, f_i) arrays (concatenated logically on the last dim).

    Returns (z, mu, logvar), each (B, output_dim) float32."""
    inputs = list(inputs)
    n_inputs = len(inputs)
    B = inputs[0].shape[0]
    feats = [int(a.shape[-1]) for a in inputs]
    hidden = params["w1"].shape[1]
    d_out = params["w2"].shape[1]
    assert params["w1"].shape[0] == sum(feats)

    # ---- wrapper-side parameter preprocessing (one-time, tiny) ----------------
    # Fold mlp3 into the heads (net is never an output) and fuse mu/logvar heads.
    wmu_f = params["w3"] @ params["wmu"]
    bmu_f = params["b3"] @ params["wmu"] + params["bmu"]
    wlv_f = params["w3"] @ params["wlv"]
    blv_f = params["b3"] @ params["wlv"] + params["blv"]
    w_head = jnp.concatenate([wmu_f, wlv_f], axis=1).astype(jnp.bfloat16)  # (D, 2D)
    b_head = jnp.concatenate([bmu_f, blv_f], axis=1)                       # (1, 2D) f32

    # Split W1 into per-input row blocks; bf16 MXU operands.
    offs = [0]
    for f in feats:
        offs.append(offs[-1] + f)
    w1_blocks = [
        params["w1"][offs[i]:offs[i + 1], :].astype(jnp.bfloat16)
        for i in range(n_inputs)
    ]
    w2 = params["w2"].astype(jnp.bfloat16)
    xs = [a.astype(jnp.bfloat16) for a in inputs]

    # ---- batch tiling: big tiles, but keep >=2 grid steps when B allows it ----
    tile = min(batch_tile, max(8, _round_up(B, 16) // 2))
    Bp = _round_up(B, tile)
    if Bp != B:
        pad_rows = Bp - B
        xs = [jnp.pad(a, ((0, pad_rows), (0, 0))) for a in xs]
        noise_p = jnp.pad(noise, ((0, pad_rows), (0, 0)))
    else:
        noise_p = noise

    out_cols = _round_up(3 * d_out, 128)   # lane-dense fused output width
    grid = (Bp // tile,)

    def row_spec(cols):
        return pl.BlockSpec((tile, cols), lambda i: (i, 0))

    def full_spec(r, c):
        # weights / biases: same full block every grid step (stay VMEM-resident)
        return pl.BlockSpec((r, c), lambda i: (0, 0))

    in_specs = (
        [row_spec(f) for f in feats]                       # x_i
        + [full_spec(f, hidden) for f in feats]            # W1_i
        + [
            full_spec(1, hidden),                          # b1
            full_spec(hidden, d_out),                      # W2
            full_spec(1, d_out),                           # b2
            full_spec(d_out, 2 * d_out),                   # fused head weight
            full_spec(1, 2 * d_out),                       # fused head bias
            row_spec(d_out),                               # noise
        ]
    )
    out_specs = pl.BlockSpec((tile, out_cols), lambda i: (i, 0))

    fused = pl.pallas_call(
        _make_kernel(n_inputs, d_out, out_cols),
        out_shape=jax.ShapeDtypeStruct((Bp, out_cols), jnp.float32),
        grid=grid,
        in_specs=in_specs,
        out_specs=out_specs,
        compiler_params=pltpu.CompilerParams(
            dimension_semantics=("parallel",),
        ),
    )(*xs, *w1_blocks, params["b1"], w2, params["b2"], w_head, b_head, noise_p)

    z = fused[:B, :d_out]
    mu = fused[:B, d_out:2 * d_out]
    logvar = fused[:B, 2 * d_out:3 * d_out]
    return z, mu, logvar


def init_params(key, input_dim, output_dim, hidden_dim=128):
    """Deterministic init mimicking nn.Linear's U(-1/sqrt(fan_in), 1/sqrt(fan_in)).

    Weights stored as (in, out); biases as (1, out)."""
    def linear(k, fan_in, fan_out):
        kw, kb = jax.random.split(k)
        bound = 1.0 / jnp.sqrt(fan_in)
        w = jax.random.uniform(kw, (fan_in, fan_out), jnp.float32, -bound, bound)
        b = jax.random.uniform(kb, (1, fan_out), jnp.float32, -bound, bound)
        return w, b

    k1, k2, k3, k4, k5 = jax.random.split(key, 5)
    w1, b1 = linear(k1, input_dim, hidden_dim)
    w2, b2 = linear(k2, hidden_dim, output_dim)
    w3, b3 = linear(k3, output_dim, output_dim)
    wmu, bmu = linear(k4, output_dim, output_dim)
    wlv, blv = linear(k5, output_dim, output_dim)
    return dict(w1=w1, b1=b1, w2=w2, b2=b2, w3=w3, b3=b3,
                wmu=wmu, bmu=bmu, wlv=wlv, blv=blv)


if __name__ == "__main__":
    key = jax.random.PRNGKey(0)
    k_in1, k_in2, k_params, k_noise = jax.random.split(key, 4)

    # Small, module-consistent shapes: two input tensors concatenated on the
    # last dim -> input_dim = 16 + 16 = 32; output_dim = 32; batch = 8.
    B = 8
    feat_a, feat_b = 16, 16
    input_dim = feat_a + feat_b
    output_dim = 32

    inputs = [
        jax.random.normal(k_in1, (B, feat_a), jnp.float32),
        jax.random.normal(k_in2, (B, feat_b), jnp.float32),
    ]
    params = init_params(k_params, input_dim, output_dim)

    # torch.randn(*mu.shape) equivalent, passed into the kernel for determinism.
    # TODO(synk): could generate in-kernel via pltpu.prng_random_bits instead.
    noise = jax.random.normal(k_noise, (B, output_dim), jnp.float32)

    z, mu, logvar = actor_encoder_forward(inputs, params, noise)
    jax.block_until_ready((z, mu, logvar))

    # Pure-JAX reference that mirrors the kernel's bf16 MXU operands / f32
    # accumulation, but keeps the ORIGINAL (un-fused, un-folded) layer structure.
    def ref(inputs):
        bf = jnp.bfloat16
        lr = lambda v: jnp.where(v > 0, v, NEG_SLOPE * v)
        x = jnp.concatenate(inputs, axis=-1)
        dot = lambda a, w: jnp.dot(a.astype(bf), w.astype(bf),
                                   preferred_element_type=jnp.float32)
        h = lr(dot(x, params["w1"]) + params["b1"])
        h = lr(dot(h, params["w2"]) + params["b2"])
        net = dot(h, params["w3"]) + params["b3"]
        mu_r = dot(net, params["wmu"]) + params["bmu"]
        lv_r = dot(net, params["wlv"]) + params["blv"]
        z_r = mu_r + jnp.exp(lv_r / 2.0) * noise
        return z_r, mu_r, lv_r

    z_r, mu_r, lv_r = ref(inputs)
    # Folding W3 into the heads + bf16 quantization points differ slightly from
    # the layer-by-layer reference; tolerance reflects bf16 operand precision.
    assert jnp.allclose(z, z_r, atol=3e-2, rtol=3e-2)
    assert jnp.allclose(mu, mu_r, atol=3e-2, rtol=3e-2)
    assert jnp.allclose(logvar, lv_r, atol=3e-2, rtol=3e-2)

    print("KERNEL_OK")
</pallas_src>

<mosaic_0001>
module attributes {stable_mosaic.version = 11 : i64} {
  func.func @kernel(%arg0: i32, %arg1: memref<8x16xbf16, #tpu.memory_space<vmem>>, %arg2: memref<8x16xbf16, #tpu.memory_space<vmem>>, %arg3: memref<16x128xbf16, #tpu.memory_space<vmem>>, %arg4: memref<16x128xbf16, #tpu.memory_space<vmem>>, %arg5: memref<1x128xf32, #tpu.memory_space<vmem>>, %arg6: memref<128x32xbf16, #tpu.memory_space<vmem>>, %arg7: memref<1x32xf32, #tpu.memory_space<vmem>>, %arg8: memref<32x64xbf16, #tpu.memory_space<vmem>>, %arg9: memref<1x64xf32, #tpu.memory_space<vmem>>, %arg10: memref<8x32xf32, #tpu.memory_space<vmem>>, %arg11: memref<8x128xf32, #tpu.memory_space<vmem>>) attributes {dimension_semantics = [#tpu.dimension_semantics<parallel>], iteration_bounds = array<i64: 1>, scalar_prefetch = 0 : i64, scratch_operands = 0 : i64, tpu.core_type = #tpu.core_type<tc>, window_params = [{transform_indices = @transform_0, window_bounds = array<i64: 8, 16>}, {transform_indices = @transform_1, window_bounds = array<i64: 8, 16>}, {pipeline_mode = #tpu.pipeline_mode<synchronous>, transform_indices = @transform_2, window_bounds = array<i64: 16, 128>}, {pipeline_mode = #tpu.pipeline_mode<synchronous>, transform_indices = @transform_3, window_bounds = array<i64: 16, 128>}, {pipeline_mode = #tpu.pipeline_mode<synchronous>, transform_indices = @transform_4, window_bounds = array<i64: 1, 128>}, {pipeline_mode = #tpu.pipeline_mode<synchronous>, transform_indices = @transform_5, window_bounds = array<i64: 128, 32>}, {pipeline_mode = #tpu.pipeline_mode<synchronous>, transform_indices = @transform_6, window_bounds = array<i64: 1, 32>}, {pipeline_mode = #tpu.pipeline_mode<synchronous>, transform_indices = @transform_7, window_bounds = array<i64: 32, 64>}, {pipeline_mode = #tpu.pipeline_mode<synchronous>, transform_indices = @transform_8, window_bounds = array<i64: 1, 64>}, {transform_indices = @transform_9, window_bounds = array<i64: 8, 32>}, {transform_indices = @transform_10, window_bounds = array<i64: 8, 128>}]} {
    %c0 = arith.constant 0 : index
    %c0_0 = arith.constant 0 : index
    %0 = vector.load %arg1[%c0, %c0_0] : memref<8x16xbf16, #tpu.memory_space<vmem>>, vector<8x16xbf16>
    %c0_1 = arith.constant 0 : index
    %c0_2 = arith.constant 0 : index
    %1 = vector.load %arg3[%c0_1, %c0_2] : memref<16x128xbf16, #tpu.memory_space<vmem>>, vector<16x128xbf16>
    %cst = arith.constant dense<0.000000e+00> : vector<8x128xf32>
    %2 = tpu.matmul %0, %1, %cst {dimension_numbers = #tpu.dot_dimension_numbers<[1], [0], [0], [1], [0, 0, 1, 1], [], []>} : vector<8x16xbf16>, vector<16x128xbf16>, vector<8x128xf32> -> vector<8x128xf32>
    %c0_3 = arith.constant 0 : index
    %c0_4 = arith.constant 0 : index
    %3 = vector.load %arg2[%c0_3, %c0_4] : memref<8x16xbf16, #tpu.memory_space<vmem>>, vector<8x16xbf16>
    %c0_5 = arith.constant 0 : index
    %c0_6 = arith.constant 0 : index
    %4 = vector.load %arg4[%c0_5, %c0_6] : memref<16x128xbf16, #tpu.memory_space<vmem>>, vector<16x128xbf16>
    %cst_7 = arith.constant dense<0.000000e+00> : vector<8x128xf32>
    %5 = tpu.matmul %3, %4, %cst_7 {dimension_numbers = #tpu.dot_dimension_numbers<[1], [0], [0], [1], [0, 0, 1, 1], [], []>} : vector<8x16xbf16>, vector<16x128xbf16>, vector<8x128xf32> -> vector<8x128xf32>
    %6 = arith.addf %2, %5 : vector<8x128xf32>
    %c0_8 = arith.constant 0 : index
    %c0_9 = arith.constant 0 : index
    %7 = vector.load %arg5[%c0_8, %c0_9] : memref<1x128xf32, #tpu.memory_space<vmem>>, vector<1x128xf32>
    %8 = vector.broadcast %7 : vector<1x128xf32> to vector<8x128xf32>
    %9 = arith.addf %6, %8 : vector<8x128xf32>
    %cst_10 = arith.constant 0.000000e+00 : f32
    %10 = vector.broadcast %cst_10 : f32 to vector<8x128xf32>
    %11 = arith.cmpf ogt, %9, %10 : vector<8x128xf32>
    %cst_11 = arith.constant 0.00999999977 : f32
    %12 = vector.broadcast %cst_11 : f32 to vector<8x128xf32>
    %13 = arith.mulf %12, %9 : vector<8x128xf32>
    %14 = arith.select %11, %9, %13 : vector<8x128xi1>, vector<8x128xf32>
    %15 = arith.truncf %14 : vector<8x128xf32> to vector<8x128xbf16>
    %c0_12 = arith.constant 0 : index
    %c0_13 = arith.constant 0 : index
    %16 = vector.load %arg6[%c0_12, %c0_13] : memref<128x32xbf16, #tpu.memory_space<vmem>>, vector<128x32xbf16>
    %cst_14 = arith.constant dense<0.000000e+00> : vector<8x32xf32>
    %17 = tpu.matmul %15, %16, %cst_14 {dimension_numbers = #tpu.dot_dimension_numbers<[1], [0], [0], [1], [0, 0, 1, 1], [], []>} : vector<8x128xbf16>, vector<128x32xbf16>, vector<8x32xf32> -> vector<8x32xf32>
    %c0_15 = arith.constant 0 : index
    %c0_16 = arith.constant 0 : index
    %18 = vector.load %arg7[%c0_15, %c0_16] : memref<1x32xf32, #tpu.memory_space<vmem>>, vector<1x32xf32>
    %19 = vector.broadcast %18 : vector<1x32xf32> to vector<8x32xf32>
    %20 = arith.addf %17, %19 : vector<8x32xf32>
    %cst_17 = arith.constant 0.000000e+00 : f32
    %21 = vector.broadcast %cst_17 : f32 to vector<8x32xf32>
    %22 = arith.cmpf ogt, %20, %21 : vector<8x32xf32>
    %cst_18 = arith.constant 0.00999999977 : f32
    %23 = vector.broadcast %cst_18 : f32 to vector<8x32xf32>
    %24 = arith.mulf %23, %20 : vector<8x32xf32>
    %25 = arith.select %22, %20, %24 : vector<8x32xi1>, vector<8x32xf32>
    %26 = arith.truncf %25 : vector<8x32xf32> to vector<8x32xbf16>
    %c0_19 = arith.constant 0 : index
    %c0_20 = arith.constant 0 : index
    %27 = vector.load %arg8[%c0_19, %c0_20] : memref<32x64xbf16, #tpu.memory_space<vmem>>, vector<32x64xbf16>
    %cst_21 = arith.constant dense<0.000000e+00> : vector<8x64xf32>
    %28 = tpu.matmul %26, %27, %cst_21 {dimension_numbers = #tpu.dot_dimension_numbers<[1], [0], [0], [1], [0, 0, 1, 1], [], []>} : vector<8x32xbf16>, vector<32x64xbf16>, vector<8x64xf32> -> vector<8x64xf32>
    %c0_22 = arith.constant 0 : index
    %c0_23 = arith.constant 0 : index
    %29 = vector.load %arg9[%c0_22, %c0_23] : memref<1x64xf32, #tpu.memory_space<vmem>>, vector<1x64xf32>
    %30 = vector.broadcast %29 : vector<1x64xf32> to vector<8x64xf32>
    %31 = arith.addf %28, %30 : vector<8x64xf32>
    %32 = vector.extract_strided_slice %31 {offsets = [0, 0], sizes = [8, 32], strides = [1, 1]} : vector<8x64xf32> to vector<8x32xf32>
    %33 = vector.extract_strided_slice %31 {offsets = [0, 32], sizes = [8, 32], strides = [1, 1]} : vector<8x64xf32> to vector<8x32xf32>
    %cst_24 = arith.constant 5.000000e-01 : f32
    %34 = vector.broadcast %cst_24 : f32 to vector<8x32xf32>
    %35 = arith.mulf %33, %34 : vector<8x32xf32>
    %36 = math.exp %35 : vector<8x32xf32>
    %c0_25 = arith.constant 0 : index
    %c0_26 = arith.constant 0 : index
    %37 = vector.load %arg10[%c0_25, %c0_26] : memref<8x32xf32, #tpu.memory_space<vmem>>, vector<8x32xf32>
    %38 = arith.mulf %36, %37 : vector<8x32xf32>
    %39 = arith.addf %32, %38 : vector<8x32xf32>
    %cst_27 = arith.constant 0.000000e+00 : f32
    %40 = vector.broadcast %cst_27 : f32 to vector<8x32xf32>
    %41 = tpu.concatenate %39, %32, %33, %40 in 1 : vector<8x32xf32>, vector<8x32xf32>, vector<8x32xf32>, vector<8x32xf32> -> vector<8x128xf32>
    %c0_28 = arith.constant 0 : index
    %c0_29 = arith.constant 0 : index
    %42 = vector.load %arg11[%c0_28, %c0_29] : memref<8x128xf32, #tpu.memory_space<vmem>>, vector<8x128xf32>
    tpu.vector_store %arg11[%c0_28, %c0_29], %41 {strides = array<i32>} : memref<8x128xf32, #tpu.memory_space<vmem>>, vector<8x128xf32>,
    return
  }
  func.func @transform_0(%arg0: i32) -> (i32, i32) {
    %c0_i32 = arith.constant 0 : i32
    %c0_i32_0 = arith.constant 0 : i32
    return %arg0, %c0_i32 : i32, i32
  }
  func.func @transform_1(%arg0: i32) -> (i32, i32) {
    %c0_i32 = arith.constant 0 : i32
    %c0_i32_0 = arith.constant 0 : i32
    return %arg0, %c0_i32 : i32, i32
  }
  func.func @transform_2(%arg0: i32) -> (i32, i32) {
    %c0_i32 = arith.constant 0 : i32
    %c0_i32_0 = arith.constant 0 : i32
    %c0_i32_1 = arith.constant 0 : i32
    return %c0_i32, %c0_i32_0 : i32, i32
  }
  func.func @transform_3(%arg0: i32) -> (i32, i32) {
    %c0_i32 = arith.constant 0 : i32
    %c0_i32_0 = arith.constant 0 : i32
    %c0_i32_1 = arith.constant 0 : i32
    return %c0_i32, %c0_i32_0 : i32, i32
  }
  func.func @transform_4(%arg0: i32) -> (i32, i32) {
    %c0_i32 = arith.constant 0 : i32
    %c0_i32_0 = arith.constant 0 : i32
    %c0_i32_1 = arith.constant 0 : i32
    return %c0_i32, %c0_i32_0 : i32, i32
  }
  func.func @transform_5(%arg0: i32) -> (i32, i32) {
    %c0_i32 = arith.constant 0 : i32
    %c0_i32_0 = arith.constant 0 : i32
    %c0_i32_1 = arith.constant 0 : i32
    return %c0_i32, %c0_i32_0 : i32, i32
  }
  func.func @transform_6(%arg0: i32) -> (i32, i32) {
    %c0_i32 = arith.constant 0 : i32
    %c0_i32_0 = arith.constant 0 : i32
    %c0_i32_1 = arith.constant 0 : i32
    return %c0_i32, %c0_i32_0 : i32, i32
  }
  func.func @transform_7(%arg0: i32) -> (i32, i32) {
    %c0_i32 = arith.constant 0 : i32
    %c0_i32_0 = arith.constant 0 : i32
    %c0_i32_1 = arith.constant 0 : i32
    return %c0_i32, %c0_i32_0 : i32, i32
  }
  func.func @transform_8(%arg0: i32) -> (i32, i32) {
    %c0_i32 = arith.constant 0 : i32
    %c0_i32_0 = arith.constant 0 : i32
    %c0_i32_1 = arith.constant 0 : i32
    return %c0_i32, %c0_i32_0 : i32, i32
  }
  func.func @transform_9(%arg0: i32) -> (i32, i32) {
    %c0_i32 = arith.constant 0 : i32
    %c0_i32_0 = arith.constant 0 : i32
    return %arg0, %c0_i32 : i32, i32
  }
  func.func @transform_10(%arg0: i32) -> (i32, i32) {
    %c0_i32 = arith.constant 0 : i32
    %c0_i32_0 = arith.constant 0 : i32
    return %arg0, %c0_i32 : i32, i32
  }
}

</mosaic_0001>

<bundles_post_ra>
// kernel: actor_encoder_forward.1
= control target key start
LH: loop header
LB: loop body
LE: loop exit
PB: predicated region body
PF: predicated region fallthrough
CT: control target
= control target key end

     0   :  { %v455_v0 = vmov 0.0   ;;  %vm456_vm0 = vmmov 0   ;;  %vm48_vm1 = vcmask 130048   ;;  %vm291_vm4 = vcmask 261120   ;;  %s595_s3 = inlined_call_operand.vmem [shape: bf16[16,128], index: 3, kind: input, shape index: {}]   ;;  %s596_s1 = inlined_call_operand.vmem [shape: bf16[8,16], index: 1, kind: input, shape index: {}]   ;;  %s597_s2 = inlined_call_operand.vmem [shape: bf16[16,128], index: 2, kind: input, shape index: {}]   ;;  %s598_s5 = inlined_call_operand.vmem [shape: bf16[128,32], index: 5, kind: input, shape index: {}]   ;;  %s599_s0 = inlined_call_operand.vmem [shape: bf16[8,16], index: 0, kind: input, shape index: {}]   ;;  %s600_s4 = inlined_call_operand.vmem [shape: f32[1,128], index: 4, kind: input, shape index: {}]   ;;  %s601_s7 = inlined_call_operand.vmem [shape: bf16[32,64], index: 7, kind: input, shape index: {}]   ;;  %s602_s9 = inlined_call_operand.vmem [shape: f32[8,32], index: 9, kind: input, shape index: {}]   ;;  %s603_s6 = inlined_call_operand.vmem [shape: f32[1,32], index: 6, kind: input, shape index: {}]   ;;  %s604_s8 = inlined_call_operand.vmem [shape: f32[1,64], index: 8, kind: input, shape index: {}]   ;;  %s605_s10 = inlined_call_operand.vmem [shape: f32[8,128], index: 10, kind: output, shape index: {}]  }
   0x1   :  { %397 = vmatprep.subr.bf16.mxu1 %v455_v0  ;;  %v441_v1 = vld [vmem:[%s595_s3] sm:$0xff]   ;;  %399 = vmatprep.mubr.msk.bf16.mxu1 %vm456_vm0, %v455_v0  ;;  %v444_v5 = vld [vmem:[%s598_s5 + $0x8] sm:$0xff]   ;;  %v445_v6 = vld [vmem:[%s598_s5 + $0x10] sm:$0xff]   ;;  %s457_s3 = smov 32   ;;  %vm354_vm5 = vcmask 523264   ;;  %vm356_vm6 = vcmask 785408  }
   0x2   :  { %409 = vmatprep.subr.bf16.mxu0 %v455_v0  ;;  %425 = vmatprep.mubr.msk.bf16.mxu0 %vm456_vm0, %v455_v0  ;;  %v39_v2 = vld [vmem:[%s596_s1] sm:$0xf]  ;;  %v446_v8 = vld [vmem:[%s598_s5 + $0x18] sm:$0xff]   ;;  %v448_v10 = vld [vmem:[%s598_s5 + $0x28] sm:$0xff]  }
   0x3   :  { %398 = vmatpush3.bf16.msra.mxu1 %v441_v1  ;;  %v442_v3 = vld [vmem:[%s597_s2] sm:$0xff]   ;;  %v449_v11 = vld [vmem:[%s598_s5 + $0x30] sm:$0xff]   ;;  %v450_v12 = vld [vmem:[%s598_s5 + $0x38] sm:$0xff]  }
   0x4   :  { %403 = vmatprep.subr.bf16.mxu1 %v455_v0  ;;  %v443_v4 = vld [vmem:[%s598_s5] sm:$0xff]   ;;  %v452_v28 = vld [vmem:[%s601_s7 + $0x8] sm:$0xff]  }
   0x5   :  { %410 = vmatpush3.bf16.msra.mxu0 %v443_v4  ;;  %v36_v7 = vld [vmem:[%s599_s0] sm:$0xf] }
   0x6   :  { %400 = vmatmul.mubr.msk.bf16.vlgmr.msra.gmra.mrb[0].mxu1 %vm48_vm1, %v39_v2  ;;  %411 = vmatprep.subr.bf16.mxu0 %v455_v0  ;;  %v447_v9 = vld [vmem:[%s598_s5 + $0x20] sm:$0xff]  }
   0x7   :  { %404 = vmatpush3.bf16.msra.mxu1 %v442_v3  ;;  %405 = vmatprep.mubr.msk.bf16.mxu1 %vm456_vm0, %v455_v0  ;;  %v367_v18 = vld [vmem:[%s600_s4] ss:$0 sm:$0xff] }
   0x8   :  { %429 = vmatprep.subr.bf16.mxu1 %v455_v0  ;;  %v451_v27 = vld [vmem:[%s601_s7] sm:$0xff]  }
   0x9   :  { %412 = vmatpush3.bf16.msra.mxu0 %v444_v5  ;;  %v338_v29 = vld [vmem:[%s602_s9] sm:$0xff] }
   0xa   :  { %413 = vmatprep.subr.bf16.mxu0 %v455_v0  ;;  %340 = vrot.lane.b32.xlu0 %v338_v29, %s457_s3  ;;  %v368_v30 = vld [vmem:[%s603_s6] ss:$0 sm:$0xff]  ;;  %s458_s6 = smov 96  }
   0xb   :  { %v377_v39 = vld [vmem:[%s604_s8] ss:$0 sm:$0xff] }
   0xd   :  { %414 = vmatpush3.bf16.msra.mxu0 %v445_v6 }
   0xe   :  { %406 = vmatmul.mubr.msk.bf16.vlgmr.msra.gmra.mrb[4].mxu1 %vm48_vm1, %v36_v7  ;;  %415 = vmatprep.subr.bf16.mxu0 %v455_v0 }
   0xf   :  { %433 = vmatprep.mubr.msk.bf16.mxu1 %vm456_vm0, %v455_v0  ;;  %430 = vmatpush3.bf16.msra.mxu1 %v451_v27 }
  0x10   :  { %431 = vmatprep.subr.bf16.mxu1 %v455_v0 }
  0x11   :  { %416 = vmatpush3.bf16.msra.mxu0 %v446_v8 }
  0x12   :  { %417 = vmatprep.subr.bf16.mxu0 %v455_v0 }
  0x13   :  { %432 = vmatpush3.bf16.msra.mxu1 %v452_v28 }
  0x15   :  { %418 = vmatpush3.bf16.msra.mxu0 %v447_v9 }
  0x16   :  { %419 = vmatprep.subr.bf16.mxu0 %v455_v0 }
  0x19   :  { %420 = vmatpush3.bf16.msra.mxu0 %v448_v10 }
  0x1a   :  { %421 = vmatprep.subr.bf16.mxu0 %v455_v0 }
  0x1d   :  { %422 = vmatpush3.bf16.msra.mxu0 %v449_v11 }
  0x1e   :  { %423 = vmatprep.subr.bf16.mxu0 %v455_v0 }
  0x21   :  { %424 = vmatpush3.bf16.msra.mxu0 %v450_v12 }
  0x7c   :  { %v341_v47 = vpop.permute.xlu0 %340 }
  0xd9   :  { %v86_v13 = vpop.f32.mrb[0].mxu1 }
  0xda   :  { %v401_v14 = vpop.f32.mrb[1].mxu1 }
  0xdb   :  { %v89_v15 = vpop.f32.mrb[2].mxu1 }
  0xdc   :  { %v402_v16 = vpop.f32.mrb[3].mxu1 }
  0xe1   :  { %v135_v17 = vpop.f32.mrb[4].mxu1 }
  0xe2   :  { %v136_v19 = vadd.f32 %v135_v17, %v86_v13  ;;  %v407_v20 = vpop.f32.mrb[5].mxu1 }
  0xe3   :  { %v138_v21 = vpop.f32.mrb[6].mxu1 }
  0xe4   :  { %v148_v22 = vadd.f32 %v367_v18, %v136_v19  ;;  %v408_v23 = vpop.f32.mrb[7].mxu1 }
  0xe6   :  { %v150_v24 = vmul.f32 0.01, %v148_v22  ;;  %vm149_vm2 = vcmp.gt.f32.partialorder %v148_v22, 0.0 }
  0xe8   :  { %v151_v25 = vsel %vm149_vm2, %v148_v22, %v150_v24 }
  0xe9   :  { %v152_v26 = vpack.c.bf16 %v151_v25, %v151_v25 }
  0xeb   :  { %426 = vmatmul.mubr.bf16.vlgmr.msra.gmra.mrb[0].mxu0 %v152_v26 }
 0x1be   :  { %v258_v31 = vpop.f32.mrb[0].mxu0 }
 0x1bf   :  { %v259_v32 = vadd.f32 %v368_v30, %v258_v31  ;;  %v427_v33 = vpop.f32.mrb[1].mxu0 }
 0x1c0   :  { %v261_v34 = vpop.f32.mrb[2].mxu0 }
 0x1c1   :  { %vm264_vm3 = vcmp.gt.f32.partialorder %v259_v32, 0.0  ;;  %v265_v35 = vmul.f32 0.01, %v259_v32  ;;  %v428_v36 = vpop.f32.mrb[3].mxu0 }
 0x1c3   :  { %v266_v37 = vsel %vm264_vm3, %v259_v32, %v265_v35 }
 0x1c4   :  { %v267_v38 = vpack.c.bf16 %v266_v37, %v266_v37 }
 0x1c6   :  { %434 = vmatmul.mubr.msk.bf16.vlgmr.msra.gmra.mrb[8].mxu1 %vm291_vm4, %v267_v38 }
 0x299   :  { %v329_v40 = vpop.f32.mrb[8].mxu1 }
 0x29a   :  { %v330_v41 = vadd.f32 %v377_v39, %v329_v40  ;;  %v435_v42 = vpop.f32.mrb[9].mxu1 }
 0x29b   :  { %v332_v43 = vpop.f32.mrb[10].mxu1 }
 0x29c   :  { %v335_v44 = vmul.f32 0.5, %v330_v41  ;;  %350 = vrot.lane.b32.xlu1 %v330_v41, %s457_s3  ;;  %v436_v45 = vpop.f32.mrb[11].mxu1 }
 0x29e   :  { %v336_v46 = vmul.f32 1.442695, %v335_v44 }
 0x2a0   :  { %453 = vpow2.f32 %v336_v46 }
 0x2aa   :  { %v454_v48 = vpop.eup %453 }
 0x2ab   :  { %v343_v49 = vmul.f32 %v454_v48, %v341_v47 }
 0x2ad   :  { %345 = vrot.lane.b32.xlu0 %v343_v49, %s458_s6 }
 0x30e   :  { %v351_v52 = vpop.permute.xlu1 %350 }
 0x31f   :  { %v346_v50 = vpop.permute.xlu0 %345 }
 0x320   :  { %v348_v51 = vadd.f32 %v346_v50, %v330_v41 }
 0x322   :  { %v353_v53 = vsel %vm291_vm4, %v348_v51, %v351_v52 }
 0x323   :  { %v355_v54 = vsel %vm354_vm5, %v353_v53, %v351_v52 }
 0x324   :  { %v357_v55 = vsel %vm356_vm6, %v355_v54, 0.0 }
 0x325   :  { %358 = vst [vmem:[%s605_s10] sm:$0xff] %v357_v55 }

</bundles_post_ra>
